<compile_context>
chip_gen: v6e
topology: v6e:2x2x1
jax: 0.10.0
libtpu: 0.0.40
codegen_flags: <defaults>
</compile_context>

<pallas_src>
import functools

import jax
import jax.numpy as jnp
from jax.experimental import pallas as pl
from jax.experimental.pallas import tpu as pltpu

N_IN = 119
N_IN_PAD = 128           # lane-aligned input width
DIMS = [N_IN, 256, 256, 128, 64, 8]

_SELU_ALPHA = 1.6732632423543772
_SELU_SCALE = 1.0507009873554805


def _selu(x):
    return _SELU_SCALE * jnp.where(x > 0, x, _SELU_ALPHA * (jnp.exp(x) - 1.0))


def mlp_kernel(x_ref,
               w1_ref, b1_ref,
               w2_ref, b2_ref,
               w3_ref, b3_ref,
               w4_ref, b4_ref,
               w5_ref, b5_ref,
               o_ref):
    # x tile: (TB, 128) f32. Weights arrive already in bf16; biases in f32.
    # bf16 MXU operands, f32 accumulation; all elementwise math in f32.
    h = jnp.dot(x_ref[...].astype(jnp.bfloat16), w1_ref[...],
                preferred_element_type=jnp.float32) + b1_ref[...]
    h = _selu(h)

    h = jnp.dot(h.astype(jnp.bfloat16), w2_ref[...],
                preferred_element_type=jnp.float32) + b2_ref[...]
    h = _selu(h)
    # dropout1 == identity (eval mode)

    h = jnp.dot(h.astype(jnp.bfloat16), w3_ref[...],
                preferred_element_type=jnp.float32) + b3_ref[...]
    h = _selu(h)
    # dropout2 == identity (eval mode)

    h = jnp.dot(h.astype(jnp.bfloat16), w4_ref[...],
                preferred_element_type=jnp.float32) + b4_ref[...]
    h = _selu(h)

    h = jnp.dot(h.astype(jnp.bfloat16), w5_ref[...],
                preferred_element_type=jnp.float32) + b5_ref[...]
    o_ref[...] = jnp.tanh(h).astype(o_ref.dtype)


def _round_up(n, m):
    return ((n + m - 1) // m) * m


@functools.partial(jax.jit, static_argnames=("tb",))
def net_forward(x, params, tb=256):
    """x: (B, 119) float32. params: list of (W, b) with W stored as (in, out)."""
    B = x.shape[0]
    # Batch tile: MXU-aligned (256) when the batch is big enough, otherwise the
    # smallest multiple of 8 sublanes that covers the batch.
    tb = min(tb, _round_up(max(B, 1), 8))
    B_pad = _round_up(B, tb)
    grid = (B_pad // tb,)

    x_p = x
    if B_pad != B:
        x_p = jnp.pad(x_p, ((0, B_pad - B), (0, 0)))
    # Zero-pad 119 -> 128 features (zero rows of W1 contribute exactly zero).
    x_p = jnp.pad(x_p, ((0, 0), (0, N_IN_PAD - N_IN)))

    flat = []
    for li, (w, b) in enumerate(params):
        if li == 0:
            w = jnp.pad(w, ((0, N_IN_PAD - N_IN), (0, 0)))
        flat.append(w.astype(jnp.bfloat16))       # bf16 MXU operands
        flat.append(b.astype(jnp.float32))        # f32 bias add

    # Weights/biases: full-array blocks, constant index_map -> resident in VMEM
    # across all batch tiles (DMA'd once).
    param_specs = [pl.BlockSpec(a.shape, lambda i: (0, 0)) for a in flat]

    out = pl.pallas_call(
        mlp_kernel,
        out_shape=jax.ShapeDtypeStruct((B_pad, DIMS[-1]), jnp.float32),
        grid=grid,
        in_specs=[pl.BlockSpec((tb, N_IN_PAD), lambda i: (i, 0))] + param_specs,
        out_specs=pl.BlockSpec((tb, DIMS[-1]), lambda i: (i, 0)),
        compiler_params=pltpu.CompilerParams(
            dimension_semantics=("parallel",)),
    )(x_p, *flat)

    return out[:B]


def init_params(key):
    """Deterministic init matching PyTorch Linear shapes (stored transposed)."""
    params = []
    for i in range(len(DIMS) - 1):
        fan_in, fan_out = DIMS[i], DIMS[i + 1]
        key, kw, kb = jax.random.split(key, 3)
        bound = 1.0 / jnp.sqrt(fan_in)
        w = jax.random.uniform(kw, (fan_in, fan_out), jnp.float32, -bound, bound)
        b = jax.random.uniform(kb, (1, fan_out), jnp.float32, -bound, bound)
        params.append((w, b))
    return params


def reference_forward(x, params, emulate_bf16=False):
    h = x
    for i, (w, b) in enumerate(params):
        if emulate_bf16:
            h = jnp.dot(h.astype(jnp.bfloat16), w.astype(jnp.bfloat16),
                        preferred_element_type=jnp.float32) + b
        else:
            h = jnp.dot(h, w, preferred_element_type=jnp.float32) + b
        h = _selu(h) if i < len(params) - 1 else jnp.tanh(h)
    return h


if __name__ == "__main__":
    key = jax.random.PRNGKey(0)
    kx, kp = jax.random.split(key)
    params = init_params(kp)

    # Small batch (fits in a single 8-row tile).
    batch = 8
    x = jax.random.normal(kx, (batch, N_IN), jnp.float32)
    out = jax.block_until_ready(net_forward(x, params))
    assert out.shape == (batch, DIMS[-1]), out.shape

    ref_bf16 = reference_forward(x, params, emulate_bf16=True)
    ref_f32 = reference_forward(x, params, emulate_bf16=False)
    assert jnp.allclose(out, ref_bf16, atol=1e-4, rtol=1e-4), "mismatch vs bf16 ref"
    assert jnp.allclose(out, ref_f32, atol=5e-2, rtol=5e-2), "mismatch vs f32 ref"

    # Non-multiple-of-tile batch: exercises the grid, padding and resident weights.
    batch2 = 1000
    x2 = jax.random.normal(jax.random.PRNGKey(1), (batch2, N_IN), jnp.float32)
    out2 = jax.block_until_ready(net_forward(x2, params))
    assert out2.shape == (batch2, DIMS[-1]), out2.shape
    ref2 = reference_forward(x2, params, emulate_bf16=True)
    assert jnp.allclose(out2, ref2, atol=1e-4, rtol=1e-4), "mismatch (tiled batch)"

    print("KERNEL_OK")
</pallas_src>

<mosaic_0001>
module attributes {stable_mosaic.version = 11 : i64} {
  func.func @mlp_kernel(%arg0: i32, %arg1: memref<8x128xf32, #tpu.memory_space<vmem>>, %arg2: memref<128x256xbf16, #tpu.memory_space<vmem>>, %arg3: memref<1x256xf32, #tpu.memory_space<vmem>>, %arg4: memref<256x256xbf16, #tpu.memory_space<vmem>>, %arg5: memref<1x256xf32, #tpu.memory_space<vmem>>, %arg6: memref<256x128xbf16, #tpu.memory_space<vmem>>, %arg7: memref<1x128xf32, #tpu.memory_space<vmem>>, %arg8: memref<128x64xbf16, #tpu.memory_space<vmem>>, %arg9: memref<1x64xf32, #tpu.memory_space<vmem>>, %arg10: memref<64x8xbf16, #tpu.memory_space<vmem>>, %arg11: memref<1x8xf32, #tpu.memory_space<vmem>>, %arg12: memref<8x8xf32, #tpu.memory_space<vmem>>) attributes {dimension_semantics = [#tpu.dimension_semantics<parallel>], iteration_bounds = array<i64: 1>, scalar_prefetch = 0 : i64, scratch_operands = 0 : i64, tpu.core_type = #tpu.core_type<tc>, window_params = [{transform_indices = @transform_0, window_bounds = array<i64: 8, 128>}, {pipeline_mode = #tpu.pipeline_mode<synchronous>, transform_indices = @transform_1, window_bounds = array<i64: 128, 256>}, {pipeline_mode = #tpu.pipeline_mode<synchronous>, transform_indices = @transform_2, window_bounds = array<i64: 1, 256>}, {pipeline_mode = #tpu.pipeline_mode<synchronous>, transform_indices = @transform_3, window_bounds = array<i64: 256, 256>}, {pipeline_mode = #tpu.pipeline_mode<synchronous>, transform_indices = @transform_4, window_bounds = array<i64: 1, 256>}, {pipeline_mode = #tpu.pipeline_mode<synchronous>, transform_indices = @transform_5, window_bounds = array<i64: 256, 128>}, {pipeline_mode = #tpu.pipeline_mode<synchronous>, transform_indices = @transform_6, window_bounds = array<i64: 1, 128>}, {pipeline_mode = #tpu.pipeline_mode<synchronous>, transform_indices = @transform_7, window_bounds = array<i64: 128, 64>}, {pipeline_mode = #tpu.pipeline_mode<synchronous>, transform_indices = @transform_8, window_bounds = array<i64: 1, 64>}, {pipeline_mode = #tpu.pipeline_mode<synchronous>, transform_indices = @transform_9, window_bounds = array<i64: 64, 8>}, {pipeline_mode = #tpu.pipeline_mode<synchronous>, transform_indices = @transform_10, window_bounds = array<i64: 1, 8>}, {transform_indices = @transform_11, window_bounds = array<i64: 8, 8>}]} {
    %c0 = arith.constant 0 : index
    %c0_0 = arith.constant 0 : index
    %0 = vector.load %arg1[%c0, %c0_0] : memref<8x128xf32, #tpu.memory_space<vmem>>, vector<8x128xf32>
    %1 = arith.truncf %0 : vector<8x128xf32> to vector<8x128xbf16>
    %c0_1 = arith.constant 0 : index
    %c0_2 = arith.constant 0 : index
    %2 = vector.load %arg2[%c0_1, %c0_2] : memref<128x256xbf16, #tpu.memory_space<vmem>>, vector<128x256xbf16>
    %cst = arith.constant dense<0.000000e+00> : vector<8x256xf32>
    %3 = tpu.matmul %1, %2, %cst {dimension_numbers = #tpu.dot_dimension_numbers<[1], [0], [0], [1], [0, 0, 1, 1], [], []>} : vector<8x128xbf16>, vector<128x256xbf16>, vector<8x256xf32> -> vector<8x256xf32>
    %c0_3 = arith.constant 0 : index
    %c0_4 = arith.constant 0 : index
    %4 = vector.load %arg3[%c0_3, %c0_4] : memref<1x256xf32, #tpu.memory_space<vmem>>, vector<1x256xf32>
    %5 = vector.broadcast %4 : vector<1x256xf32> to vector<8x256xf32>
    %6 = arith.addf %3, %5 : vector<8x256xf32>
    %cst_5 = arith.constant 0.000000e+00 : f32
    %7 = vector.broadcast %cst_5 : f32 to vector<8x256xf32>
    %8 = arith.cmpf ogt, %6, %7 : vector<8x256xf32>
    %9 = math.exp %6 : vector<8x256xf32>
    %cst_6 = arith.constant 1.000000e+00 : f32
    %10 = vector.broadcast %cst_6 : f32 to vector<8x256xf32>
    %11 = arith.subf %9, %10 : vector<8x256xf32>
    %cst_7 = arith.constant 1.67326319 : f32
    %12 = vector.broadcast %cst_7 : f32 to vector<8x256xf32>
    %13 = arith.mulf %12, %11 : vector<8x256xf32>
    %14 = arith.select %8, %6, %13 : vector<8x256xi1>, vector<8x256xf32>
    %cst_8 = arith.constant 1.05070102 : f32
    %15 = vector.broadcast %cst_8 : f32 to vector<8x256xf32>
    %16 = arith.mulf %15, %14 : vector<8x256xf32>
    %17 = arith.truncf %16 : vector<8x256xf32> to vector<8x256xbf16>
    %c0_9 = arith.constant 0 : index
    %c0_10 = arith.constant 0 : index
    %18 = vector.load %arg4[%c0_9, %c0_10] : memref<256x256xbf16, #tpu.memory_space<vmem>>, vector<256x256xbf16>
    %cst_11 = arith.constant dense<0.000000e+00> : vector<8x256xf32>
    %19 = tpu.matmul %17, %18, %cst_11 {dimension_numbers = #tpu.dot_dimension_numbers<[1], [0], [0], [1], [0, 0, 1, 1], [], []>} : vector<8x256xbf16>, vector<256x256xbf16>, vector<8x256xf32> -> vector<8x256xf32>
    %c0_12 = arith.constant 0 : index
    %c0_13 = arith.constant 0 : index
    %20 = vector.load %arg5[%c0_12, %c0_13] : memref<1x256xf32, #tpu.memory_space<vmem>>, vector<1x256xf32>
    %21 = vector.broadcast %20 : vector<1x256xf32> to vector<8x256xf32>
    %22 = arith.addf %19, %21 : vector<8x256xf32>
    %cst_14 = arith.constant 0.000000e+00 : f32
    %23 = vector.broadcast %cst_14 : f32 to vector<8x256xf32>
    %24 = arith.cmpf ogt, %22, %23 : vector<8x256xf32>
    %25 = math.exp %22 : vector<8x256xf32>
    %cst_15 = arith.constant 1.000000e+00 : f32
    %26 = vector.broadcast %cst_15 : f32 to vector<8x256xf32>
    %27 = arith.subf %25, %26 : vector<8x256xf32>
    %cst_16 = arith.constant 1.67326319 : f32
    %28 = vector.broadcast %cst_16 : f32 to vector<8x256xf32>
    %29 = arith.mulf %28, %27 : vector<8x256xf32>
    %30 = arith.select %24, %22, %29 : vector<8x256xi1>, vector<8x256xf32>
    %cst_17 = arith.constant 1.05070102 : f32
    %31 = vector.broadcast %cst_17 : f32 to vector<8x256xf32>
    %32 = arith.mulf %31, %30 : vector<8x256xf32>
    %33 = arith.truncf %32 : vector<8x256xf32> to vector<8x256xbf16>
    %c0_18 = arith.constant 0 : index
    %c0_19 = arith.constant 0 : index
    %34 = vector.load %arg6[%c0_18, %c0_19] : memref<256x128xbf16, #tpu.memory_space<vmem>>, vector<256x128xbf16>
    %cst_20 = arith.constant dense<0.000000e+00> : vector<8x128xf32>
    %35 = tpu.matmul %33, %34, %cst_20 {dimension_numbers = #tpu.dot_dimension_numbers<[1], [0], [0], [1], [0, 0, 1, 1], [], []>} : vector<8x256xbf16>, vector<256x128xbf16>, vector<8x128xf32> -> vector<8x128xf32>
    %c0_21 = arith.constant 0 : index
    %c0_22 = arith.constant 0 : index
    %36 = vector.load %arg7[%c0_21, %c0_22] : memref<1x128xf32, #tpu.memory_space<vmem>>, vector<1x128xf32>
    %37 = vector.broadcast %36 : vector<1x128xf32> to vector<8x128xf32>
    %38 = arith.addf %35, %37 : vector<8x128xf32>
    %cst_23 = arith.constant 0.000000e+00 : f32
    %39 = vector.broadcast %cst_23 : f32 to vector<8x128xf32>
    %40 = arith.cmpf ogt, %38, %39 : vector<8x128xf32>
    %41 = math.exp %38 : vector<8x128xf32>
    %cst_24 = arith.constant 1.000000e+00 : f32
    %42 = vector.broadcast %cst_24 : f32 to vector<8x128xf32>
    %43 = arith.subf %41, %42 : vector<8x128xf32>
    %cst_25 = arith.constant 1.67326319 : f32
    %44 = vector.broadcast %cst_25 : f32 to vector<8x128xf32>
    %45 = arith.mulf %44, %43 : vector<8x128xf32>
    %46 = arith.select %40, %38, %45 : vector<8x128xi1>, vector<8x128xf32>
    %cst_26 = arith.constant 1.05070102 : f32
    %47 = vector.broadcast %cst_26 : f32 to vector<8x128xf32>
    %48 = arith.mulf %47, %46 : vector<8x128xf32>
    %49 = arith.truncf %48 : vector<8x128xf32> to vector<8x128xbf16>
    %c0_27 = arith.constant 0 : index
    %c0_28 = arith.constant 0 : index
    %50 = vector.load %arg8[%c0_27, %c0_28] : memref<128x64xbf16, #tpu.memory_space<vmem>>, vector<128x64xbf16>
    %cst_29 = arith.constant dense<0.000000e+00> : vector<8x64xf32>
    %51 = tpu.matmul %49, %50, %cst_29 {dimension_numbers = #tpu.dot_dimension_numbers<[1], [0], [0], [1], [0, 0, 1, 1], [], []>} : vector<8x128xbf16>, vector<128x64xbf16>, vector<8x64xf32> -> vector<8x64xf32>
    %c0_30 = arith.constant 0 : index
    %c0_31 = arith.constant 0 : index
    %52 = vector.load %arg9[%c0_30, %c0_31] : memref<1x64xf32, #tpu.memory_space<vmem>>, vector<1x64xf32>
    %53 = vector.broadcast %52 : vector<1x64xf32> to vector<8x64xf32>
    %54 = arith.addf %51, %53 : vector<8x64xf32>
    %cst_32 = arith.constant 0.000000e+00 : f32
    %55 = vector.broadcast %cst_32 : f32 to vector<8x64xf32>
    %56 = arith.cmpf ogt, %54, %55 : vector<8x64xf32>
    %57 = math.exp %54 : vector<8x64xf32>
    %cst_33 = arith.constant 1.000000e+00 : f32
    %58 = vector.broadcast %cst_33 : f32 to vector<8x64xf32>
    %59 = arith.subf %57, %58 : vector<8x64xf32>
    %cst_34 = arith.constant 1.67326319 : f32
    %60 = vector.broadcast %cst_34 : f32 to vector<8x64xf32>
    %61 = arith.mulf %60, %59 : vector<8x64xf32>
    %62 = arith.select %56, %54, %61 : vector<8x64xi1>, vector<8x64xf32>
    %cst_35 = arith.constant 1.05070102 : f32
    %63 = vector.broadcast %cst_35 : f32 to vector<8x64xf32>
    %64 = arith.mulf %63, %62 : vector<8x64xf32>
    %65 = arith.truncf %64 : vector<8x64xf32> to vector<8x64xbf16>
    %c0_36 = arith.constant 0 : index
    %c0_37 = arith.constant 0 : index
    %66 = vector.load %arg10[%c0_36, %c0_37] : memref<64x8xbf16, #tpu.memory_space<vmem>>, vector<64x8xbf16>
    %cst_38 = arith.constant dense<0.000000e+00> : vector<8x8xf32>
    %67 = tpu.matmul %65, %66, %cst_38 {dimension_numbers = #tpu.dot_dimension_numbers<[1], [0], [0], [1], [0, 0, 1, 1], [], []>} : vector<8x64xbf16>, vector<64x8xbf16>, vector<8x8xf32> -> vector<8x8xf32>
    %c0_39 = arith.constant 0 : index
    %c0_40 = arith.constant 0 : index
    %68 = vector.load %arg11[%c0_39, %c0_40] : memref<1x8xf32, #tpu.memory_space<vmem>>, vector<1x8xf32>
    %69 = vector.broadcast %68 : vector<1x8xf32> to vector<8x8xf32>
    %70 = arith.addf %67, %69 : vector<8x8xf32>
    %71 = math.tanh %70 : vector<8x8xf32>
    %c0_41 = arith.constant 0 : index
    %c0_42 = arith.constant 0 : index
    %72 = vector.load %arg12[%c0_41, %c0_42] : memref<8x8xf32, #tpu.memory_space<vmem>>, vector<8x8xf32>
    tpu.vector_store %arg12[%c0_41, %c0_42], %71 {strides = array<i32>} : memref<8x8xf32, #tpu.memory_space<vmem>>, vector<8x8xf32>,
    return
  }
  func.func @transform_0(%arg0: i32) -> (i32, i32) {
    %c0_i32 = arith.constant 0 : i32
    %c0_i32_0 = arith.constant 0 : i32
    return %arg0, %c0_i32 : i32, i32
  }
  func.func @transform_1(%arg0: i32) -> (i32, i32) {
    %c0_i32 = arith.constant 0 : i32
    %c0_i32_0 = arith.constant 0 : i32
    %c0_i32_1 = arith.constant 0 : i32
    return %c0_i32, %c0_i32_0 : i32, i32
  }
  func.func @transform_2(%arg0: i32) -> (i32, i32) {
    %c0_i32 = arith.constant 0 : i32
    %c0_i32_0 = arith.constant 0 : i32
    %c0_i32_1 = arith.constant 0 : i32
    return %c0_i32, %c0_i32_0 : i32, i32
  }
  func.func @transform_3(%arg0: i32) -> (i32, i32) {
    %c0_i32 = arith.constant 0 : i32
    %c0_i32_0 = arith.constant 0 : i32
    %c0_i32_1 = arith.constant 0 : i32
    return %c0_i32, %c0_i32_0 : i32, i32
  }
  func.func @transform_4(%arg0: i32) -> (i32, i32) {
    %c0_i32 = arith.constant 0 : i32
    %c0_i32_0 = arith.constant 0 : i32
    %c0_i32_1 = arith.constant 0 : i32
    return %c0_i32, %c0_i32_0 : i32, i32
  }
  func.func @transform_5(%arg0: i32) -> (i32, i32) {
    %c0_i32 = arith.constant 0 : i32
    %c0_i32_0 = arith.constant 0 : i32
    %c0_i32_1 = arith.constant 0 : i32
    return %c0_i32, %c0_i32_0 : i32, i32
  }
  func.func @transform_6(%arg0: i32) -> (i32, i32) {
    %c0_i32 = arith.constant 0 : i32
    %c0_i32_0 = arith.constant 0 : i32
    %c0_i32_1 = arith.constant 0 : i32
    return %c0_i32, %c0_i32_0 : i32, i32
  }
  func.func @transform_7(%arg0: i32) -> (i32, i32) {
    %c0_i32 = arith.constant 0 : i32
    %c0_i32_0 = arith.constant 0 : i32
    %c0_i32_1 = arith.constant 0 : i32
    return %c0_i32, %c0_i32_0 : i32, i32
  }
  func.func @transform_8(%arg0: i32) -> (i32, i32) {
    %c0_i32 = arith.constant 0 : i32
    %c0_i32_0 = arith.constant 0 : i32
    %c0_i32_1 = arith.constant 0 : i32
    return %c0_i32, %c0_i32_0 : i32, i32
  }
  func.func @transform_9(%arg0: i32) -> (i32, i32) {
    %c0_i32 = arith.constant 0 : i32
    %c0_i32_0 = arith.constant 0 : i32
    %c0_i32_1 = arith.constant 0 : i32
    return %c0_i32, %c0_i32_0 : i32, i32
  }
  func.func @transform_10(%arg0: i32) -> (i32, i32) {
    %c0_i32 = arith.constant 0 : i32
    %c0_i32_0 = arith.constant 0 : i32
    %c0_i32_1 = arith.constant 0 : i32
    return %c0_i32, %c0_i32_0 : i32, i32
  }
  func.func @transform_11(%arg0: i32) -> (i32, i32) {
    %c0_i32 = arith.constant 0 : i32
    %c0_i32_0 = arith.constant 0 : i32
    return %arg0, %c0_i32 : i32, i32
  }
}

</mosaic_0001>

<bundles_post_ra>
// kernel: net_forward.1
= control target key start
LH: loop header
LB: loop body
LE: loop exit
PB: predicated region body
PF: predicated region fallthrough
CT: control target
= control target key end

     0   :  { %v1164_v2 = vmov 0   ;;  %s1481_s0 = inlined_call_operand.vmem [shape: f32[8,128], index: 0, kind: input, shape index: {}]   ;;  %s1482_s1 = inlined_call_operand.vmem [shape: bf16[128,256], index: 1, kind: input, shape index: {}]   ;;  %s1483_s2 = inlined_call_operand.vmem [shape: f32[1,256], index: 2, kind: input, shape index: {}]   ;;  %s1484_s3 = inlined_call_operand.vmem [shape: bf16[256,256], index: 3, kind: input, shape index: {}]   ;;  %s1485_s4 = inlined_call_operand.vmem [shape: f32[1,256], index: 4, kind: input, shape index: {}]   ;;  %s1486_s5 = inlined_call_operand.vmem [shape: bf16[256,128], index: 5, kind: input, shape index: {}]   ;;  %s1487_s6 = inlined_call_operand.vmem [shape: f32[1,128], index: 6, kind: input, shape index: {}]   ;;  %s1488_s7 = inlined_call_operand.vmem [shape: bf16[128,64], index: 7, kind: input, shape index: {}]   ;;  %s1489_s8 = inlined_call_operand.vmem [shape: f32[1,64], index: 8, kind: input, shape index: {}]   ;;  %s1490_s9 = inlined_call_operand.vmem [shape: bf16[64,8], index: 9, kind: input, shape index: {}]   ;;  %s1491_s10 = inlined_call_operand.vmem [shape: f32[1,8], index: 10, kind: input, shape index: {}]   ;;  %s1492_s11 = inlined_call_operand.hbm [shape: f32[8,8], index: 11, kind: output, shape index: {}]  }
   0x1   :  { %v1028_v0 = vld [vmem:[%s1482_s1 + $0x74] ss:$8 sps:$4 sm:$0xff]   ;;  %v1030_v1 = vld [vmem:[%s1482_s1 + $0x70] ss:$8 sps:$4 sm:$0xff]   ;;  %182 = vmatprep.mubr.bf16.mxu0 %v1164_v2  ;;  %v1031_v3 = vld [vmem:[%s1482_s1 + $0x64] ss:$8 sps:$4 sm:$0xff]  }
   0x2   :  { %150 = vmatprep.subr.bf16.mxu0 %v1028_v0  ;;  %v1033_v4 = vld [vmem:[%s1482_s1 + $0x60] ss:$8 sps:$4 sm:$0xff]   ;;  %v1034_v5 = vld [vmem:[%s1482_s1 + $0x54] ss:$8 sps:$4 sm:$0xff]   ;;  %v1036_v6 = vld [vmem:[%s1482_s1 + $0x50] ss:$8 sps:$4 sm:$0xff]  }
   0x3   :  { %151 = vmatpush1.bf16.msra.mxu0 %v1030_v1  ;;  %v1037_v7 = vld [vmem:[%s1482_s1 + $0x44] ss:$8 sps:$4 sm:$0xff]   ;;  %v1039_v8 = vld [vmem:[%s1482_s1 + $0x40] ss:$8 sps:$4 sm:$0xff]   ;;  %v1040_v9 = vld [vmem:[%s1482_s1 + $0x34] ss:$8 sps:$4 sm:$0xff]  }
   0x4   :  { %152 = vmatprep.subr.bf16.mxu0 %v1031_v3  ;;  %v1052_v10 = vld [vmem:[%s1484_s3 + $0x74] ss:$8 sps:$4 sm:$0xff]   ;;  %v1054_v11 = vld [vmem:[%s1484_s3 + $0x70] ss:$8 sps:$4 sm:$0xff]   ;;  %v1055_v12 = vld [vmem:[%s1484_s3 + $0x64] ss:$8 sps:$4 sm:$0xff]  }
   0x5   :  { %411 = vmatprep.subr.bf16.mxu1 %v1052_v10  ;;  %v1042_v13 = vld [vmem:[%s1482_s1 + $0x30] ss:$8 sps:$4 sm:$0xff]   ;;  %v1057_v14 = vld [vmem:[%s1484_s3 + $0x60] ss:$8 sps:$4 sm:$0xff]   ;;  %v1058_v15 = vld [vmem:[%s1484_s3 + $0x54] ss:$8 sps:$4 sm:$0xff]  }
   0x6   :  { %412 = vmatpush1.bf16.msra.mxu1 %v1054_v11  ;;  %v1043_v16 = vld [vmem:[%s1482_s1 + $0x24] ss:$8 sps:$4 sm:$0xff]   ;;  %v1045_v17 = vld [vmem:[%s1482_s1 + $0x20] ss:$8 sps:$4 sm:$0xff]   ;;  %v1060_v18 = vld [vmem:[%s1484_s3 + $0x50] ss:$8 sps:$4 sm:$0xff]  }
   0x7   :  { %153 = vmatpush1.bf16.msra.mxu0 %v1033_v4  ;;  %413 = vmatprep.subr.bf16.mxu1 %v1055_v12  ;;  %v1061_v19 = vld [vmem:[%s1484_s3 + $0x44] ss:$8 sps:$4 sm:$0xff]   ;;  %v1046_v20 = vld [vmem:[%s1482_s1 + $0x14] ss:$8 sps:$4 sm:$0xff]   ;;  %v1048_v21 = vld [vmem:[%s1482_s1 + $0x10] ss:$8 sps:$4 sm:$0xff]  }
   0x8   :  { %154 = vmatprep.subr.bf16.mxu0 %v1034_v5  ;;  %v1049_v22 = vld [vmem:[%s1482_s1 + $0x4] ss:$8 sps:$4 sm:$0xff]   ;;  %v1063_v23 = vld [vmem:[%s1484_s3 + $0x40] ss:$8 sps:$4 sm:$0xff]   ;;  %v1064_v24 = vld [vmem:[%s1484_s3 + $0x34] ss:$8 sps:$4 sm:$0xff]  }
   0x9   :  { %v1066_v25 = vld [vmem:[%s1484_s3 + $0x30] ss:$8 sps:$4 sm:$0xff]   ;;  %v1051_v26 = vld [vmem:[%s1482_s1] ss:$8 sps:$4 sm:$0xff]   ;;  %v1067_v28 = vld [vmem:[%s1484_s3 + $0x24] ss:$8 sps:$4 sm:$0xff]  }
   0xa   :  { %414 = vmatpush1.bf16.msra.mxu1 %v1057_v14  ;;  %v40_v27 = vld [vmem:[%s1481_s0] sm:$0xff]  ;;  %v1070_v30 = vld [vmem:[%s1484_s3 + $0x14] ss:$8 sps:$4 sm:$0xff]   ;;  %v1072_v32 = vld [vmem:[%s1484_s3 + $0x10] ss:$8 sps:$4 sm:$0xff]  }
   0xb   :  { %155 = vmatpush1.bf16.msra.mxu0 %v1036_v6  ;;  %415 = vmatprep.subr.bf16.mxu1 %v1058_v15  ;;  %v1069_v29 = vld [vmem:[%s1484_s3 + $0x20] ss:$8 sps:$4 sm:$0xff]   ;;  %v41_v31 = vpack.c.bf16 %v40_v27, %v40_v27  ;;  %v1073_v33 = vld [vmem:[%s1484_s3 + $0x4] ss:$8 sps:$4 sm:$0xff]   ;;  %v1076_v35 = vld [vmem:[%s1484_s3 + $0xf4] ss:$8 sps:$4 sm:$0xff]  }
   0xc   :  { %156 = vmatprep.subr.bf16.mxu0 %v1037_v7  ;;  %v1075_v34 = vld [vmem:[%s1484_s3] ss:$8 sps:$4 sm:$0xff]  }
   0xe   :  { %416 = vmatpush1.bf16.msra.mxu1 %v1060_v18 }
   0xf   :  { %157 = vmatpush1.bf16.msra.mxu0 %v1039_v8  ;;  %417 = vmatprep.subr.bf16.mxu1 %v1061_v19 }
  0x10   :  { %158 = vmatprep.subr.bf16.mxu0 %v1040_v9 }
  0x12   :  { %418 = vmatpush1.bf16.msra.mxu1 %v1063_v23 }
  0x13   :  { %159 = vmatpush1.bf16.msra.mxu0 %v1042_v13  ;;  %419 = vmatprep.subr.bf16.mxu1 %v1064_v24 }
  0x14   :  { %160 = vmatprep.subr.bf16.mxu0 %v1043_v16 }
  0x16   :  { %420 = vmatpush1.bf16.msra.mxu1 %v1066_v25 }
  0x17   :  { %161 = vmatpush1.bf16.msra.mxu0 %v1045_v17  ;;  %421 = vmatprep.subr.bf16.mxu1 %v1067_v28 }
  0x18   :  { %162 = vmatprep.subr.bf16.mxu0 %v1046_v20 }
  0x1a   :  { %422 = vmatpush1.bf16.msra.mxu1 %v1069_v29 }
  0x1b   :  { %163 = vmatpush1.bf16.msra.mxu0 %v1048_v21  ;;  %423 = vmatprep.subr.bf16.mxu1 %v1070_v30 }
  0x1c   :  { %164 = vmatprep.subr.bf16.mxu0 %v1049_v22 }
  0x1e   :  { %424 = vmatpush1.bf16.msra.mxu1 %v1072_v32 }
  0x1f   :  { %165 = vmatpush1.bf16.msra.mxu0 %v1051_v26  ;;  %425 = vmatprep.subr.bf16.mxu1 %v1073_v33 }
  0x22   :  { %183 = vmatmul.mubr.bf16.vlgmr.msra.gmra.mxu0 %v41_v31  ;;  %426 = vmatpush1.bf16.msra.mxu1 %v1075_v34 }
  0x23   :  { %427 = vmatprep.subr.bf16.mxu1 %v1076_v35 }
  0x24   :  { %16 = vsyncpa [#allocation3], 0  ;;  %v1078_v36 = vld [vmem:[%s1484_s3 + $0xf0] ss:$8 sps:$4 sm:$0xff]   ;;  %v1079_v37 = vld [vmem:[%s1484_s3 + $0xe4] ss:$8 sps:$4 sm:$0xff]   ;;  %v60_v52 = vlaneseq }
  0x25   :  { %v1081_v38 = vld [vmem:[%s1484_s3 + $0xe0] ss:$8 sps:$4 sm:$0xff]   ;;  %v1082_v39 = vld [vmem:[%s1484_s3 + $0xd4] ss:$8 sps:$4 sm:$0xff]   ;;  %v1084_v40 = vld [vmem:[%s1484_s3 + $0xd0] ss:$8 sps:$4 sm:$0xff]  }
  0x26   :  { %428 = vmatpush2.bf16.msra.mxu1 %v1078_v36  ;;  %v1085_v41 = vld [vmem:[%s1484_s3 + $0xc4] ss:$8 sps:$4 sm:$0xff]   ;;  %v1087_v42 = vld [vmem:[%s1484_s3 + $0xc0] ss:$8 sps:$4 sm:$0xff]   ;;  %v1088_v43 = vld [vmem:[%s1484_s3 + $0xb4] ss:$8 sps:$4 sm:$0xff]  }
  0x27   :  { %429 = vmatprep.subr.bf16.mxu1 %v1079_v37  ;;  %v1090_v44 = vld [vmem:[%s1484_s3 + $0xb0] ss:$8 sps:$4 sm:$0xff]   ;;  %v1091_v45 = vld [vmem:[%s1484_s3 + $0xa4] ss:$8 sps:$4 sm:$0xff]   ;;  %v1093_v46 = vld [vmem:[%s1484_s3 + $0xa0] ss:$8 sps:$4 sm:$0xff]  }
  0x28   :  { %v1094_v47 = vld [vmem:[%s1484_s3 + $0x94] ss:$8 sps:$4 sm:$0xff]   ;;  %v1096_v48 = vld [vmem:[%s1484_s3 + $0x90] ss:$8 sps:$4 sm:$0xff]   ;;  %v1097_v49 = vld [vmem:[%s1484_s3 + $0x84] ss:$8 sps:$4 sm:$0xff]  }
  0x29   :  { %v1099_v50 = vld [vmem:[%s1484_s3 + $0x80] ss:$8 sps:$4 sm:$0xff]   ;;  %v1100_v51 = vld [vmem:[%s1486_s5 + $0x78] sm:$0xff]   ;;  %v1378_v53 = vshrl.u32 %v60_v52, 7  ;;  %v1102_v16 = vld [vmem:[%s1486_s5 + $0x70] sm:$0xff]   ;;  %vm1166_vm4 = vmmov 0  }
  0x2a   :  { %430 = vmatpush2.bf16.msra.mxu1 %v1081_v38  ;;  %956 = vmatprep.subr.bf16.mxu0 %v1100_v51  ;;  %v58_v55 = vld [vmem:[%s1483_s2] sm:$0x3]  ;;  %v1101_v15 = vld [vmem:[%s1486_s5 + $0x38] sm:$0xff]   ;;  %v1103_v17 = vld [vmem:[%s1486_s5 + $0x30] sm:$0xff]   ;;  %vm809_vm7 = vcmask 523264   ;;  %vm854_vm8 = vcmask 64512  }
  0x2b   :  { %431 = vmatprep.subr.bf16.mxu1 %v1082_v39  ;;  %v62_v54 = vsub.s32 0, %v1378_v53  ;;  %v66_v56 = vsub.s32 1, %v1378_v53  ;;  %957 = vmatpush3.bf16.msra.mxu0 %v1101_v15  ;;  %v1104_v18 = vld [vmem:[%s1486_s5 + $0x68] sm:$0xff]   ;;  %v1106_v20 = vld [vmem:[%s1486_s5 + $0x60] sm:$0xff]   ;;  %v1108_v22 = vld [vmem:[%s1486_s5 + $0x58] sm:$0xff]  }
  0x2c   :  { %958 = vmatprep.subr.bf16.mxu0 %v1102_v16  ;;  %v1105_v19 = vld [vmem:[%s1486_s5 + $0x28] sm:$0xff]   ;;  %v1107_v21 = vld [vmem:[%s1486_s5 + $0x20] sm:$0xff]   ;;  %v1109_v23 = vld [vmem:[%s1486_s5 + $0x18] sm:$0xff]  }
  0x2d   :  { %v63_v57 = vrot.slane %v58_v55, %v62_v54  ;;  %v67_v58 = vrot.slane %v58_v55, %v66_v56  ;;  %v1110_v24 = vld [vmem:[%s1486_s5 + $0x50] sm:$0xff]   ;;  %v1112_v26 = vld [vmem:[%s1486_s5 + $0x48] sm:$0xff]   ;;  %v1114_v28 = vld [vmem:[%s1486_s5 + $0x40] sm:$0xff]  }
  0x2e   :  { %432 = vmatpush2.bf16.msra.mxu1 %v1084_v40  ;;  %v1111_v25 = vld [vmem:[%s1486_s5 + $0x10] sm:$0xff]   ;;  %v1113_v27 = vld [vmem:[%s1486_s5 + $0x8] sm:$0xff]   ;;  %v1115_v29 = vld [vmem:[%s1486_s5] sm:$0xff]  }
  0x2f   :  { %433 = vmatprep.subr.bf16.mxu1 %v1085_v41  ;;  %959 = vmatpush3.bf16.msra.mxu0 %v1103_v17  ;;  %v239_v30 = vld [vmem:[%s1485_s4] sm:$0x3]  ;;  %v1116_v53 = vld [vmem:[%s1488_s7 + $0x38] sm:$0xff]   ;;  %v1117_v55 = vld [vmem:[%s1488_s7 + $0x30] sm:$0xff]  }
  0x30   :  { %960 = vmatprep.subr.bf16.mxu0 %v1104_v18  ;;  %v244_v31 = vrot.slane %v239_v30, %v62_v54  ;;  %v248_v32 = vrot.slane %v239_v30, %v66_v56  ;;  %v1165_v54 = vmov 0.0   ;;  %v1118_v56 = vld [vmem:[%s1488_s7 + $0x28] sm:$0xff]   ;;  %v1127_v15 = vld [vmem:[%s1490_s9] sm:$0xff]  }
  0x31   :  { %v940_v16 = vld [vmem:[%s1489_s8] ss:$0 sm:$0xff]  ;;  %s1167_s8 = smov [#allocation2]  }
  0x32   :  { %434 = vmatpush2.bf16.msra.mxu1 %v1087_v42  ;;  %s862_s25 = sshll.u32 %s1167_s8, 4  ;;  %s863_s25 = int_to_ptr.vmem [resolvable:$true] %s862_s25 }
  0x33   :  { %435 = vmatprep.subr.bf16.mxu1 %v1088_v43  ;;  %961 = vmatpush3.bf16.msra.mxu0 %v1105_v19  ;;  %s1142_s26 = scalar_lea.vmem %s863_s25, 128  ;;  %p1147_p1 = scmp.lt.s32.totalorder %s863_s25, %s863_s25 }
  0x34   :  { %962 = vmatprep.subr.bf16.mxu0 %v1106_v20  ;;  %p1143_p0 = scmp.ne.s32.totalorder %s863_s25, %s1142_s26  ;;  %p1148_p2 = scmp.lt.s32.totalorder %s1142_s26, %s1142_s26 }
  0x36   :  { %436 = vmatpush2.bf16.msra.mxu1 %v1090_v44  ;;  %p1149_p3 = por %p1148_p2, %p1147_p1 }
  0x37   :  { %437 = vmatprep.subr.bf16.mxu1 %v1091_v45  ;;  %963 = vmatpush3.bf16.msra.mxu0 %v1107_v21 }
  0x38   :  { %964 = vmatprep.subr.bf16.mxu0 %v1108_v22  ;;  %p1150_p4 = pnand %p1149_p3, %p1143_p0 }
  0x3a   :  { %438 = vmatpush2.bf16.msra.mxu1 %v1093_v46 }
  0x3b   :  { %439 = vmatprep.subr.bf16.mxu1 %v1094_v47  ;;  %965 = vmatpush3.bf16.msra.mxu0 %v1109_v23 }
  0x3c   :  { %966 = vmatprep.subr.bf16.mxu0 %v1110_v24 }
  0x3e   :  { %440 = vmatpush2.bf16.msra.mxu1 %v1096_v48 }
  0x3f   :  { %441 = vmatprep.subr.bf16.mxu1 %v1097_v49  ;;  %967 = vmatpush3.bf16.msra.mxu0 %v1111_v25 }
  0x40   :  { %968 = vmatprep.subr.bf16.mxu0 %v1112_v26 }
  0x42   :  { %442 = vmatpush2.bf16.msra.mxu1 %v1099_v50 }
  0x43   :  { %969 = vmatpush3.bf16.msra.mxu0 %v1113_v27  ;;  %1012 = vmatprep.subr.bf16.mxu1 %v1165_v54 }
  0x44   :  { %970 = vmatprep.subr.bf16.mxu0 %v1114_v28 }
  0x47   :  { %971 = vmatpush3.bf16.msra.mxu0 %v1115_v29  ;;  %v950_v29 = vld [vmem:[%s1491_s10] ss:$0 sm:$0xff] }
  0x48   :  { %992 = vmatprep.subr.bf16.mxu0 %v1165_v54 }
  0xe2   :  { %v184_v59 = vpop.f32.mrf.mxu0 }
  0xe3   :  { %v185_v60 = vadd.f32 %v184_v59, %v63_v57  ;;  %v1119_v57 = vld [vmem:[%s1488_s7 + $0x20] sm:$0xff]   ;;  %v1121_v59 = vld [vmem:[%s1488_s7 + $0x10] sm:$0xff]  }
  0xe4   :  { %v186_v61 = vpop.f32.mrf.mxu0 }
  0xe5   :  { %v193_v62 = vmul.f32 1.442695, %v185_v60  ;;  %v187_v63 = vadd.f32 %v186_v61, %v67_v58  ;;  %vm191_vm0 = vcmp.gt.f32.partialorder %v185_v60, 0.0  ;;  %v1120_v58 = vld [vmem:[%s1488_s7 + $0x18] sm:$0xff]   ;;  %v1123_v61 = vld [vmem:[%s1488_s7] sm:$0xff]  }
  0xe6   :  { %v188_v0 = vpop.f32.mrf.mxu0 }
  0xe7   :  { %1128 = vpow2.f32 %v193_v62  ;;  %v195_v1 = vmul.f32 1.442695, %v187_v63  ;;  %vm192_vm1 = vcmp.gt.f32.partialorder %v187_v63, 0.0 }
  0xe8   :  { %v189_v2 = vpop.f32.mrf.mxu0 }
  0xe9   :  { %1130 = vpow2.f32 %v195_v1 }
  0xf4   :  { %v1129_v3 = vpop.eup %1128 }
  0xf5   :  { %v886_v4 = vadd.f32 -1.0, %v1129_v3 }
  0xf6   :  { %v1131_v5 = vpop.eup %1130 }
  0xf7   :  { %v887_v6 = vadd.f32 -1.0, %v1131_v5  ;;  %v199_v7 = vmul.f32 1.6732632, %v886_v4 }
  0xf9   :  { %v200_v8 = vmul.f32 1.6732632, %v887_v6  ;;  %v201_v9 = vsel %vm191_vm0, %v185_v60, %v199_v7  ;;  %v1122_v60 = vld [vmem:[%s1488_s7 + $0x8] sm:$0xff]  }
  0xfa   :  { %v203_v11 = vmul.f32 1.050701, %v201_v9 }
  0xfb   :  { %v202_v10 = vsel %vm192_vm1, %v187_v63, %v200_v8  ;;  %v922_v63 = vld [vmem:[%s1487_s6] ss:$0 sm:$0xff] }
  0xfc   :  { %v204_v12 = vmul.f32 1.050701, %v202_v10  ;;  %v205_v14 = vpack.c.bf16 %v203_v11, %v203_v11 }
  0xfe   :  { %v206_v13 = vpack.c.bf16 %v204_v12, %v204_v12  ;;  %v1124_v12 = vld [vmem:[%s1490_s9 + $0x18] sm:$0xff]  }
 0x100   :  { %443 = vmatprep.mubr.bf16.mxu1 %v206_v13  ;;  %v1125_v13 = vld [vmem:[%s1490_s9 + $0x10] sm:$0xff]  }
 0x101   :  { %444 = vmatmul.mubr.bf16.vlgmr.msra.gmra.mxu1 %v205_v14  ;;  %v1126_v14 = vld [vmem:[%s1490_s9 + $0x8] sm:$0xff]  }
 0x102   :  { %1020 = vmatprep.mubr.msk.bf16.mxu1 %vm1166_vm4, %v1165_v54  ;;  %1013 = vmatpush3.bf16.msra.mxu1 %v1124_v12 }
 0x103   :  { %1014 = vmatprep.subr.bf16.mxu1 %v1165_v54 }
 0x106   :  { %1015 = vmatpush3.bf16.msra.mxu1 %v1125_v13 }
 0x107   :  { %1016 = vmatprep.subr.bf16.mxu1 %v1165_v54 }
 0x10a   :  { %1017 = vmatpush3.bf16.msra.mxu1 %v1126_v14 }
 0x10b   :  { %1018 = vmatprep.subr.bf16.mxu1 %v1165_v54 }
 0x10e   :  { %1019 = vmatpush3.bf16.msra.mxu1 %v1127_v15 }
 0x1c1   :  { %v445_v33 = vpop.f32.mrf.mxu1 }
 0x1c2   :  { %v446_v34 = vadd.f32 %v445_v33, %v244_v31 }
 0x1c3   :  { %v447_v35 = vpop.f32.mrf.mxu1 }
 0x1c4   :  { %v454_v36 = vmul.f32 1.442695, %v446_v34  ;;  %v448_v37 = vadd.f32 %v447_v35, %v248_v32  ;;  %vm452_vm2 = vcmp.gt.f32.partialorder %v446_v34, 0.0 }
 0x1c5   :  { %v449_v38 = vpop.f32.mrf.mxu1 }
 0x1c6   :  { %1132 = vpow2.f32 %v454_v36  ;;  %v456_v39 = vmul.f32 1.442695, %v448_v37  ;;  %vm453_vm3 = vcmp.gt.f32.partialorder %v448_v37, 0.0 }
 0x1c7   :  { %v450_v40 = vpop.f32.mrf.mxu1 }
 0x1c8   :  { %1134 = vpow2.f32 %v456_v39 }
 0x1d3   :  { %v1133_v41 = vpop.eup %1132 }
 0x1d4   :  { %v920_v42 = vadd.f32 -1.0, %v1133_v41 }
 0x1d5   :  { %v1135_v43 = vpop.eup %1134 }
 0x1d6   :  { %v460_v44 = vmul.f32 1.6732632, %v920_v42  ;;  %v921_v45 = vadd.f32 -1.0, %v1135_v43 }
 0x1d8   :  { %v462_v46 = vsel %vm452_vm2, %v446_v34, %v460_v44  ;;  %v461_v47 = vmul.f32 1.6732632, %v921_v45 }
 0x1d9   :  { %v464_v48 = vmul.f32 1.050701, %v462_v46 }
 0x1da   :  { %v463_v49 = vsel %vm453_vm3, %v448_v37, %v461_v47 }
 0x1db   :  { %v465_v50 = vmul.f32 1.050701, %v463_v49  ;;  %v466_v52 = vpack.c.bf16 %v464_v48, %v464_v48 }
 0x1dd   :  { %v467_v51 = vpack.c.bf16 %v465_v50, %v465_v50 }
 0x1df   :  { %635 = vmatprep.mubr.bf16.mxu0 %v467_v51 }
 0x1e0   :  { %636 = vmatmul.mubr.bf16.vlgmr.msra.gmra.mxu0 %v466_v52 }
 0x1e1   :  { %993 = vmatpush3.bf16.msra.mxu0 %v1116_v53  ;;  %1008 = vmatprep.mubr.msk.bf16.mxu0 %vm1166_vm4, %v1165_v54 }
 0x1e2   :  { %994 = vmatprep.subr.bf16.mxu0 %v1165_v54 }
 0x1e5   :  { %995 = vmatpush3.bf16.msra.mxu0 %v1117_v55 }
 0x1e6   :  { %996 = vmatprep.subr.bf16.mxu0 %v1165_v54 }
 0x1e9   :  { %997 = vmatpush3.bf16.msra.mxu0 %v1118_v56 }
 0x1ea   :  { %998 = vmatprep.subr.bf16.mxu0 %v1165_v54 }
 0x1ed   :  { %999 = vmatpush3.bf16.msra.mxu0 %v1119_v57 }
 0x1ee   :  { %1000 = vmatprep.subr.bf16.mxu0 %v1165_v54 }
 0x1f1   :  { %1001 = vmatpush3.bf16.msra.mxu0 %v1120_v58 }
 0x1f2   :  { %1002 = vmatprep.subr.bf16.mxu0 %v1165_v54 }
 0x1f5   :  { %1003 = vmatpush3.bf16.msra.mxu0 %v1121_v59 }
 0x1f6   :  { %1004 = vmatprep.subr.bf16.mxu0 %v1165_v54 }
 0x1f9   :  { %1005 = vmatpush3.bf16.msra.mxu0 %v1122_v60 }
 0x1fa   :  { %1006 = vmatprep.subr.bf16.mxu0 %v1165_v54 }
 0x1fd   :  { %1007 = vmatpush3.bf16.msra.mxu0 %v1123_v61 }
 0x2a0   :  { %v972_v62 = vpop.f32.mrf.mxu0 }
 0x2a2   :  { %v973_v0 = vpop.f32.mrf.mxu0 }
 0x2a3   :  { %v974_v1 = vadd.f32 %v973_v0, %v972_v62 }
 0x2a4   :  { %v975_v2 = vpop.f32.mrf.mxu0 }
 0x2a5   :  { %v638_v3 = vadd.f32 %v974_v1, %v922_v63 }
 0x2a6   :  { %v976_v4 = vpop.f32.mrf.mxu0 }
 0x2a7   :  { %v644_v5 = vmul.f32 1.442695, %v638_v3  ;;  %vm643_vm5 = vcmp.gt.f32.partialorder %v638_v3, 0.0 }
 0x2a9   :  { %1136 = vpow2.f32 %v644_v5 }
 0x2b6   :  { %v1137_v6 = vpop.eup %1136 }
 0x2b7   :  { %v939_v7 = vadd.f32 -1.0, %v1137_v6 }
 0x2b9   :  { %v647_v8 = vmul.f32 1.6732632, %v939_v7 }
 0x2bb   :  { %v648_v9 = vsel %vm643_vm5, %v638_v3, %v647_v8 }
 0x2bc   :  { %v649_v10 = vmul.f32 1.050701, %v648_v9 }
 0x2be   :  { %v650_v11 = vpack.c.bf16 %v649_v10, %v649_v10 }
 0x2c0   :  { %1009 = vmatmul.mubr.bf16.vlgmr.msra.gmra.mxu0 %v650_v11 }
 0x380   :  { %v756_v17 = vpop.f32.mrf.mxu0 }
 0x381   :  { %v757_v18 = vadd.f32 %v940_v16, %v756_v17 }
 0x382   :  { %v1010_v19 = vpop.f32.mrf.mxu0 }
 0x383   :  { %v763_v20 = vmul.f32 1.442695, %v757_v18  ;;  %vm762_vm6 = vcmp.gt.f32.partialorder %v757_v18, 0.0 }
 0x384   :  { %v759_v21 = vpop.f32.mrf.mxu0 }
 0x385   :  { %1138 = vpow2.f32 %v763_v20 }
 0x386   :  { %v1011_v22 = vpop.f32.mrf.mxu0 }
 0x392   :  { %v1139_v23 = vpop.eup %1138 }
 0x393   :  { %v949_v24 = vadd.f32 -1.0, %v1139_v23 }
 0x395   :  { %v766_v25 = vmul.f32 1.6732632, %v949_v24 }
 0x397   :  { %v767_v26 = vsel %vm762_vm6, %v757_v18, %v766_v25 }
 0x398   :  { %v768_v27 = vmul.f32 1.050701, %v767_v26 }
 0x39a   :  { %v769_v28 = vpack.c.bf16 %v768_v27, %v768_v27 }
 0x39c   :  { %1021 = vmatmul.mubr.msk.bf16.vlgmr.msra.gmra.mxu1 %vm809_vm7, %v769_v28 }
 0x45c   :  { %v847_v30 = vpop.f32.mrf.mxu1 }
 0x45d   :  { %v848_v31 = vadd.f32 %v950_v29, %v847_v30 }
 0x45e   :  { %v1022_v32 = vpop.f32.mrf.mxu1 }
 0x45f   :  { %1140 = vtanh.f32 %v848_v31 }
 0x460   :  { %v850_v33 = vpop.f32.mrf.mxu1 }
 0x462   :  { %v1023_v34 = vpop.f32.mrf.mxu1 }
 0x46c   :  { %v1141_v35 = vpop.eup %1140 }
 0x46d   :  { %855 = vst.msk [vmem:[#allocation2] sm:$0xff] %vm854_vm8, %v1141_v35 }
 0x46e   :  { %1153 = shalt.err (!%p1150_p4)
}
 0x46f   :  { %865 = dma.vmem_to_hbm [thread:$0]  %s863_s25, 128, %s1492_s11, [#allocation3]  }
 0x470   :  { %1162 = dma.done.wait [#allocation3], 128  }
 0x471   :  { %1163 = vsyncadd [#allocation3], 4294967168 }
 0x472   :  { %869 = vsyncpa [#allocation3], 1 }

</bundles_post_ra>
